<compile_context>
chip_gen: v7x
topology: tpu7x:2x2x1
jax: 0.10.0
libtpu: 0.0.40
codegen_flags: <defaults>
</compile_context>

<pallas_src>
import jax
import jax.numpy as jnp
from jax import lax
from jax.experimental import pallas as pl
from jax.experimental.pallas import tpu as pltpu

_CHUNK = 128          # lanes per in-kernel chunk (one full vreg width)
_EPS = 1e-5           # torch.nn.LayerNorm default


def pair_update_kernel(pair_ref, prow_ref, mrow_ref, pcol_ref, mcol_ref,
                       eprow_ref, red_ref, expd_ref, w1_ref, b1_ref, w2_ref, b2_ref,
                       out_ref):
    """One (batch, row-tile, col-tile) step over the lane-dense pair tensor.

    pair_ref : (1, Ti, Tj*P)   lane-dense pair tile
    prow_ref : (1, Ti, P)      x-projection chunk 2 (row-indexed)
    mrow_ref : (1, Ti, 1)      row mask
    pcol_ref : (1, 1, Tj*P)    x-projection chunk 1 (column-indexed, lane dense)
    mcol_ref : (1, 1, Tj*P)    column mask repeated P times (lane dense)
    eprow_ref: (P, 128)        row-proj -> 128-lane broadcast matrix
    red_ref  : (128, G)        per-group mean reduction (entries 1/P), G = 128//P
    expd_ref : (G, 128)        group -> lane expansion (entries 1)
    w1_ref   : (128, G*nP)     block-diag(pair-LN affine folded into Linear1)
    b1_ref   : (1, G*nP)
    w2_ref   : (G*nP, 128)     block-diag(Linear2)
    b2_ref   : (1, 128)
    """
    n_chunks = pair_ref.shape[2] // _CHUNK

    m_i = mrow_ref[0].astype(jnp.float32)                            # (Ti, 1)
    p_row = prow_ref[0].astype(jnp.float32)                          # (Ti, P)
    # Row projection broadcast across the G column groups of one 128-lane chunk
    # (identical for every chunk): a tiny MXU dot instead of a lane relayout.
    prow_c = jnp.dot(p_row, eprow_ref[...],
                     preferred_element_type=jnp.float32)             # (Ti, 128)

    red = red_ref[...]
    expd = expd_ref[...]
    w1 = w1_ref[...]
    b1 = b1_ref[...]
    w2 = w2_ref[...]
    b2 = b2_ref[...]

    for c in range(n_chunks):                                        # static unroll
        lo, hi = c * _CHUNK, (c + 1) * _CHUNK
        z = pair_ref[0, :, lo:hi].astype(jnp.float32)                # (Ti, 128)
        pcol = pcol_ref[0, :, lo:hi].astype(jnp.float32)             # (1, 128)
        pm = m_i * mcol_ref[0, :, lo:hi].astype(jnp.float32)         # (Ti, 128)

        pair1 = (z + pcol + prow_c) * pm                             # (Ti, 128)

        # Per-(i,j) LayerNorm over the P lanes of each column group, via tiny
        # reduce/expand matmuls so everything stays lane-dense (no relayouts).
        mu = jnp.dot(pair1, red, preferred_element_type=jnp.float32)       # (Ti, G)
        d = pair1 - jnp.dot(mu, expd, preferred_element_type=jnp.float32)  # centered
        var = jnp.dot(d * d, red, preferred_element_type=jnp.float32)      # (Ti, G)
        inv = lax.rsqrt(var + _EPS)
        t = d * jnp.dot(inv, expd, preferred_element_type=jnp.float32)     # (Ti, 128)

        # PairTransition = Linear2(relu(Linear1(LN(pair1)))) via block-diag weights.
        h = jnp.maximum(
            jnp.dot(t, w1, preferred_element_type=jnp.float32) + b1, 0.0)  # (Ti, G*nP)
        o = jnp.dot(h, w2, preferred_element_type=jnp.float32) + b2        # (Ti, 128)

        # (pair1 + o) * pm == reference (pair1 + o*pm) * pm for a 0/1 mask.
        out_ref[0, :, lo:hi] = ((pair1 + o) * pm).astype(out_ref.dtype)


def pair_repr_update(x, pair, mask, params, *, tile_i=None, tile_j=None):
    B, N, Dt = x.shape
    P = pair.shape[-1]
    nP = params["w1"].shape[-1]
    f32 = jnp.float32

    assert _CHUNK % P == 0, "pair_dim must divide 128 for the lane-dense kernel"
    G = _CHUNK // P                                  # column groups per 128-lane chunk

    if tile_i is None:
        tile_i = min(N, 256)
    if tile_j is None:
        tile_j = min(N, 128)
    assert N % tile_i == 0 and N % tile_j == 0, "N must be divisible by the tiles"
    TJP = tile_j * P
    assert TJP % _CHUNK == 0, "tile_j * pair_dim must be a multiple of 128"

    maskf = mask.astype(f32)

    # ---- hoisted token projection (O(B*N*Dt*P), negligible vs O(B*N^2*P)) ----
    xm = x.astype(f32) * maskf[..., None]
    mu = xm.mean(-1, keepdims=True)
    var = ((xm - mu) ** 2).mean(-1, keepdims=True)
    xl = (xm - mu) * lax.rsqrt(var + _EPS) * params["ln_x_w"] + params["ln_x_b"]
    proj = xl @ params["w_x"]                                   # (B, N, 2P)
    p_col = proj[..., :P].reshape(B, 1, N * P)                  # chunk 1 (column / j), lane dense
    p_row = proj[..., P:]                                       # chunk 2 (row / i), (B, N, P)

    mask_row = maskf[..., None]                                 # (B, N, 1)
    mask_colP = jnp.repeat(maskf, P, axis=-1).reshape(B, 1, N * P)

    # ---- constants: fold pair-LN affine into Linear1; block-diag over G groups ----
    w1f = params["ln_p_w"][:, None] * params["w1"]              # (P, nP)
    b1f = params["ln_p_b"] @ params["w1"] + params["b1"]        # (nP,)
    eyeG = jnp.eye(G, dtype=f32)
    red = jnp.repeat(eyeG, P, axis=0) / P                       # (128, G)  group mean
    expd = jnp.repeat(eyeG, P, axis=1)                          # (G, 128)  group -> lanes
    eprow = jnp.tile(jnp.eye(P, dtype=f32), (1, G))             # (P, 128)  row-proj broadcast
    w1bd = jnp.kron(eyeG, w1f.astype(f32))                      # (128, G*nP)
    b1bd = jnp.tile(b1f.astype(f32), G)[None, :]                # (1, G*nP)
    w2bd = jnp.kron(eyeG, params["w2"].astype(f32))             # (G*nP, 128)
    b2bd = jnp.tile(params["b2"].astype(f32), G)[None, :]       # (1, 128)

    pair_dense = pair.reshape(B, N, N * P)                      # free, contiguous

    consts = [eprow, red, expd, w1bd, b1bd, w2bd, b2bd]

    def const_spec(a):
        return pl.BlockSpec(a.shape, lambda b, i, j: (0, 0))

    grid = (B, N // tile_i, N // tile_j)
    in_specs = [
        pl.BlockSpec((1, tile_i, TJP), lambda b, i, j: (b, i, j)),   # pair tile (dense)
        pl.BlockSpec((1, tile_i, P), lambda b, i, j: (b, i, 0)),     # row projection
        pl.BlockSpec((1, tile_i, 1), lambda b, i, j: (b, i, 0)),     # row mask
        pl.BlockSpec((1, 1, TJP), lambda b, i, j: (b, 0, j)),        # col projection (dense)
        pl.BlockSpec((1, 1, TJP), lambda b, i, j: (b, 0, j)),        # col mask (dense)
    ] + [const_spec(a) for a in consts]

    out_dense = pl.pallas_call(
        pair_update_kernel,
        out_shape=jax.ShapeDtypeStruct((B, N, N * P), pair.dtype),
        grid_spec=pltpu.PrefetchScalarGridSpec(
            num_scalar_prefetch=0,
            grid=grid,
            in_specs=in_specs,
            out_specs=pl.BlockSpec((1, tile_i, TJP), lambda b, i, j: (b, i, j)),
        ),
        compiler_params=pltpu.CompilerParams(
            dimension_semantics=("parallel", "parallel", "parallel"),
            vmem_limit_bytes=48 * 1024 * 1024),
    )(pair_dense, p_row, mask_row, p_col, mask_colP, *consts)

    return out_dense.reshape(B, N, N, P)


# ---------------- pure-JAX reference (unfolded math, for validation) ----------------
def reference(x, pair, mask, p):
    def ln(z, w, b, eps=_EPS):
        mu = z.mean(-1, keepdims=True)
        var = ((z - mu) ** 2).mean(-1, keepdims=True)
        return (z - mu) / jnp.sqrt(var + eps) * w + b

    m = mask.astype(jnp.float32)
    pm = m[:, :, None] * m[:, None, :]                      # (B, N, N)
    xm = x * m[..., None]
    xl = ln(xm, p["ln_x_w"], p["ln_x_b"])
    proj = xl @ p["w_x"]                                    # (B, N, 2P)
    P = pair.shape[-1]
    p1, p2 = proj[..., :P], proj[..., P:]
    pr = pair + p1[:, None, :, :] + p2[:, :, None, :]
    pr = pr * pm[..., None]
    t = ln(pr, p["ln_p_w"], p["ln_p_b"])
    h = jax.nn.relu(t @ p["w1"] + p["b1"])
    o = (h @ p["w2"] + p["b2"]) * pm[..., None]
    pr = pr + o
    pr = pr * pm[..., None]
    return pr


def init_params(key, Dt, P, n_exp):
    ks = jax.random.split(key, 8)
    s = 0.3
    params = dict(
        ln_x_w=1.0 + 0.1 * jax.random.normal(ks[0], (Dt,)),
        ln_x_b=0.1 * jax.random.normal(ks[1], (Dt,)),
        w_x=jax.random.normal(ks[2], (Dt, 2 * P)) * s,
        ln_p_w=1.0 + 0.1 * jax.random.normal(ks[3], (P,)),
        ln_p_b=0.1 * jax.random.normal(ks[4], (P,)),
        w1=jax.random.normal(ks[5], (P, n_exp * P)) * s,
        b1=0.05 * jax.random.normal(ks[6], (n_exp * P,)),
        w2=jax.random.normal(ks[7], (n_exp * P, P)) * s,
        b2=jnp.zeros((P,)),
    )
    return {k: v.astype(jnp.float32) for k, v in params.items()}


if __name__ == "__main__":
    # token_dim=32, pair_dim=8, expansion_factor_transition=2, use_tri_mult=False
    B, N, Dt, P, n_exp = 2, 16, 32, 8, 2
    key = jax.random.PRNGKey(0)
    kx, kp, kw = jax.random.split(key, 3)
    x = jax.random.normal(kx, (B, N, Dt), dtype=jnp.float32)
    pair = jax.random.normal(kp, (B, N, N, P), dtype=jnp.float32)
    lengths = jnp.array([N, 11])
    mask = (jnp.arange(N)[None, :] < lengths[:, None]).astype(jnp.float32)
    params = init_params(kw, Dt, P, n_exp)

    # tile_i=8, tile_j=16 -> grid (2, 2, 1); tile_j*P = 128 (one dense lane chunk).
    out = pair_repr_update(x, pair, mask, params, tile_i=8, tile_j=16)
    out = jax.block_until_ready(out)

    ref = reference(x, pair, mask, params)
    assert out.shape == (B, N, N, P)
    err = float(jnp.max(jnp.abs(out - ref)))
    assert jnp.allclose(out, ref, atol=1e-3, rtol=1e-3), f"max abs err {err}"
    print("KERNEL_OK")
</pallas_src>

<mosaic_0001>
module attributes {stable_mosaic.version = 11 : i64} {
  func.func @pair_update_kernel(%arg0: i32, %arg1: i32, %arg2: i32, %arg3: memref<1x8x128xf32, #tpu.memory_space<vmem>>, %arg4: memref<1x8x8xf32, #tpu.memory_space<vmem>>, %arg5: memref<1x8x1xf32, #tpu.memory_space<vmem>>, %arg6: memref<1x1x128xf32, #tpu.memory_space<vmem>>, %arg7: memref<1x1x128xf32, #tpu.memory_space<vmem>>, %arg8: memref<8x128xf32, #tpu.memory_space<vmem>>, %arg9: memref<128x16xf32, #tpu.memory_space<vmem>>, %arg10: memref<16x128xf32, #tpu.memory_space<vmem>>, %arg11: memref<128x256xf32, #tpu.memory_space<vmem>>, %arg12: memref<1x256xf32, #tpu.memory_space<vmem>>, %arg13: memref<256x128xf32, #tpu.memory_space<vmem>>, %arg14: memref<1x128xf32, #tpu.memory_space<vmem>>, %arg15: memref<1x8x128xf32, #tpu.memory_space<vmem>>) attributes {dimension_semantics = [#tpu.dimension_semantics<parallel>, #tpu.dimension_semantics<parallel>, #tpu.dimension_semantics<parallel>], iteration_bounds = array<i64: 2, 2, 1>, scalar_prefetch = 0 : i64, scratch_operands = 0 : i64, tpu.core_type = #tpu.core_type<tc>, window_params = [{transform_indices = @transform_0, window_bounds = array<i64: 1, 8, 128>}, {transform_indices = @transform_1, window_bounds = array<i64: 1, 8, 8>}, {transform_indices = @transform_2, window_bounds = array<i64: 1, 8, 1>}, {transform_indices = @transform_3, window_bounds = array<i64: 1, 1, 128>}, {transform_indices = @transform_4, window_bounds = array<i64: 1, 1, 128>}, {pipeline_mode = #tpu.pipeline_mode<synchronous>, transform_indices = @transform_5, window_bounds = array<i64: 8, 128>}, {pipeline_mode = #tpu.pipeline_mode<synchronous>, transform_indices = @transform_6, window_bounds = array<i64: 128, 16>}, {pipeline_mode = #tpu.pipeline_mode<synchronous>, transform_indices = @transform_7, window_bounds = array<i64: 16, 128>}, {pipeline_mode = #tpu.pipeline_mode<synchronous>, transform_indices = @transform_8, window_bounds = array<i64: 128, 256>}, {pipeline_mode = #tpu.pipeline_mode<synchronous>, transform_indices = @transform_9, window_bounds = array<i64: 1, 256>}, {pipeline_mode = #tpu.pipeline_mode<synchronous>, transform_indices = @transform_10, window_bounds = array<i64: 256, 128>}, {pipeline_mode = #tpu.pipeline_mode<synchronous>, transform_indices = @transform_11, window_bounds = array<i64: 1, 128>}, {transform_indices = @transform_12, window_bounds = array<i64: 1, 8, 128>}]} {
    %c0 = arith.constant 0 : index
    %c0_0 = arith.constant 0 : index
    %c0_1 = arith.constant 0 : index
    %0 = vector.load %arg5[%c0, %c0_0, %c0_1] : memref<1x8x1xf32, #tpu.memory_space<vmem>>, vector<1x8x1xf32>
    %1 = vector.shape_cast %0 : vector<1x8x1xf32> to vector<8x1xf32>
    %c0_2 = arith.constant 0 : index
    %c0_3 = arith.constant 0 : index
    %c0_4 = arith.constant 0 : index
    %2 = vector.load %arg4[%c0_2, %c0_3, %c0_4] : memref<1x8x8xf32, #tpu.memory_space<vmem>>, vector<1x8x8xf32>
    %3 = vector.shape_cast %2 : vector<1x8x8xf32> to vector<8x8xf32>
    %c0_5 = arith.constant 0 : index
    %c0_6 = arith.constant 0 : index
    %4 = vector.load %arg8[%c0_5, %c0_6] : memref<8x128xf32, #tpu.memory_space<vmem>>, vector<8x128xf32>
    %cst = arith.constant dense<0.000000e+00> : vector<8x128xf32>
    %5 = tpu.matmul %3, %4, %cst {dimension_numbers = #tpu.dot_dimension_numbers<[1], [0], [0], [1], [0, 0, 1, 1], [], []>} : vector<8x8xf32>, vector<8x128xf32>, vector<8x128xf32> -> vector<8x128xf32>
    %c0_7 = arith.constant 0 : index
    %c0_8 = arith.constant 0 : index
    %6 = vector.load %arg9[%c0_7, %c0_8] : memref<128x16xf32, #tpu.memory_space<vmem>>, vector<128x16xf32>
    %c0_9 = arith.constant 0 : index
    %c0_10 = arith.constant 0 : index
    %7 = vector.load %arg10[%c0_9, %c0_10] : memref<16x128xf32, #tpu.memory_space<vmem>>, vector<16x128xf32>
    %c0_11 = arith.constant 0 : index
    %c0_12 = arith.constant 0 : index
    %8 = vector.load %arg11[%c0_11, %c0_12] : memref<128x256xf32, #tpu.memory_space<vmem>>, vector<128x256xf32>
    %c0_13 = arith.constant 0 : index
    %c0_14 = arith.constant 0 : index
    %9 = vector.load %arg12[%c0_13, %c0_14] : memref<1x256xf32, #tpu.memory_space<vmem>>, vector<1x256xf32>
    %c0_15 = arith.constant 0 : index
    %c0_16 = arith.constant 0 : index
    %10 = vector.load %arg13[%c0_15, %c0_16] : memref<256x128xf32, #tpu.memory_space<vmem>>, vector<256x128xf32>
    %c0_17 = arith.constant 0 : index
    %c0_18 = arith.constant 0 : index
    %11 = vector.load %arg14[%c0_17, %c0_18] : memref<1x128xf32, #tpu.memory_space<vmem>>, vector<1x128xf32>
    %c0_19 = arith.constant 0 : index
    %c0_20 = arith.constant 0 : index
    %c0_21 = arith.constant 0 : index
    %12 = vector.load %arg3[%c0_19, %c0_20, %c0_21] : memref<1x8x128xf32, #tpu.memory_space<vmem>>, vector<1x8x128xf32>
    %13 = vector.shape_cast %12 : vector<1x8x128xf32> to vector<8x128xf32>
    %c0_22 = arith.constant 0 : index
    %c0_23 = arith.constant 0 : index
    %c0_24 = arith.constant 0 : index
    %14 = vector.load %arg6[%c0_22, %c0_23, %c0_24] : memref<1x1x128xf32, #tpu.memory_space<vmem>>, vector<1x1x128xf32>
    %15 = vector.shape_cast %14 : vector<1x1x128xf32> to vector<1x128xf32>
    %c0_25 = arith.constant 0 : index
    %c0_26 = arith.constant 0 : index
    %c0_27 = arith.constant 0 : index
    %16 = vector.load %arg7[%c0_25, %c0_26, %c0_27] : memref<1x1x128xf32, #tpu.memory_space<vmem>>, vector<1x1x128xf32>
    %17 = vector.shape_cast %16 : vector<1x1x128xf32> to vector<1x128xf32>
    %18 = vector.broadcast %1 : vector<8x1xf32> to vector<8x128xf32>
    %19 = vector.broadcast %17 : vector<1x128xf32> to vector<8x128xf32>
    %20 = arith.mulf %18, %19 : vector<8x128xf32>
    %21 = vector.broadcast %15 : vector<1x128xf32> to vector<8x128xf32>
    %22 = arith.addf %13, %21 : vector<8x128xf32>
    %23 = arith.addf %22, %5 : vector<8x128xf32>
    %24 = arith.mulf %23, %20 : vector<8x128xf32>
    %cst_28 = arith.constant dense<0.000000e+00> : vector<8x16xf32>
    %25 = tpu.matmul %24, %6, %cst_28 {dimension_numbers = #tpu.dot_dimension_numbers<[1], [0], [0], [1], [0, 0, 1, 1], [], []>} : vector<8x128xf32>, vector<128x16xf32>, vector<8x16xf32> -> vector<8x16xf32>
    %cst_29 = arith.constant dense<0.000000e+00> : vector<8x128xf32>
    %26 = tpu.matmul %25, %7, %cst_29 {dimension_numbers = #tpu.dot_dimension_numbers<[1], [0], [0], [1], [0, 0, 1, 1], [], []>} : vector<8x16xf32>, vector<16x128xf32>, vector<8x128xf32> -> vector<8x128xf32>
    %27 = arith.subf %24, %26 : vector<8x128xf32>
    %28 = arith.mulf %27, %27 : vector<8x128xf32>
    %cst_30 = arith.constant dense<0.000000e+00> : vector<8x16xf32>
    %29 = tpu.matmul %28, %6, %cst_30 {dimension_numbers = #tpu.dot_dimension_numbers<[1], [0], [0], [1], [0, 0, 1, 1], [], []>} : vector<8x128xf32>, vector<128x16xf32>, vector<8x16xf32> -> vector<8x16xf32>
    %cst_31 = arith.constant 9.99999974E-6 : f32
    %30 = vector.broadcast %cst_31 : f32 to vector<8x16xf32>
    %31 = arith.addf %29, %30 : vector<8x16xf32>
    %32 = math.rsqrt %31 : vector<8x16xf32>
    %cst_32 = arith.constant dense<0.000000e+00> : vector<8x128xf32>
    %33 = tpu.matmul %32, %7, %cst_32 {dimension_numbers = #tpu.dot_dimension_numbers<[1], [0], [0], [1], [0, 0, 1, 1], [], []>} : vector<8x16xf32>, vector<16x128xf32>, vector<8x128xf32> -> vector<8x128xf32>
    %34 = arith.mulf %27, %33 : vector<8x128xf32>
    %cst_33 = arith.constant dense<0.000000e+00> : vector<8x256xf32>
    %35 = tpu.matmul %34, %8, %cst_33 {dimension_numbers = #tpu.dot_dimension_numbers<[1], [0], [0], [1], [0, 0, 1, 1], [], []>} : vector<8x128xf32>, vector<128x256xf32>, vector<8x256xf32> -> vector<8x256xf32>
    %36 = vector.broadcast %9 : vector<1x256xf32> to vector<8x256xf32>
    %37 = arith.addf %35, %36 : vector<8x256xf32>
    %cst_34 = arith.constant 0.000000e+00 : f32
    %38 = vector.broadcast %cst_34 : f32 to vector<8x256xf32>
    %39 = arith.maximumf %37, %38 : vector<8x256xf32>
    %cst_35 = arith.constant dense<0.000000e+00> : vector<8x128xf32>
    %40 = tpu.matmul %39, %10, %cst_35 {dimension_numbers = #tpu.dot_dimension_numbers<[1], [0], [0], [1], [0, 0, 1, 1], [], []>} : vector<8x256xf32>, vector<256x128xf32>, vector<8x128xf32> -> vector<8x128xf32>
    %41 = vector.broadcast %11 : vector<1x128xf32> to vector<8x128xf32>
    %42 = arith.addf %40, %41 : vector<8x128xf32>
    %43 = arith.addf %24, %42 : vector<8x128xf32>
    %44 = arith.mulf %43, %20 : vector<8x128xf32>
    %c0_36 = arith.constant 0 : index
    %c0_37 = arith.constant 0 : index
    %c0_38 = arith.constant 0 : index
    %45 = vector.load %arg15[%c0_36, %c0_37, %c0_38] : memref<1x8x128xf32, #tpu.memory_space<vmem>>, vector<1x8x128xf32>
    %46 = vector.shape_cast %45 : vector<1x8x128xf32> to vector<8x128xf32>
    %47 = vector.shape_cast %44 : vector<8x128xf32> to vector<1x8x128xf32>
    tpu.vector_store %arg15[%c0_36, %c0_37, %c0_38], %47 {strides = array<i32>} : memref<1x8x128xf32, #tpu.memory_space<vmem>>, vector<1x8x128xf32>,
    return
  }
  func.func @transform_0(%arg0: i32, %arg1: i32, %arg2: i32) -> (i32, i32, i32) {
    %c0_i32 = arith.constant 0 : i32
    return %arg0, %arg1, %arg2 : i32, i32, i32
  }
  func.func @transform_1(%arg0: i32, %arg1: i32, %arg2: i32) -> (i32, i32, i32) {
    %c0_i32 = arith.constant 0 : i32
    %c0_i32_0 = arith.constant 0 : i32
    return %arg0, %arg1, %c0_i32 : i32, i32, i32
  }
  func.func @transform_2(%arg0: i32, %arg1: i32, %arg2: i32) -> (i32, i32, i32) {
    %c0_i32 = arith.constant 0 : i32
    %c0_i32_0 = arith.constant 0 : i32
    return %arg0, %arg1, %c0_i32 : i32, i32, i32
  }
  func.func @transform_3(%arg0: i32, %arg1: i32, %arg2: i32) -> (i32, i32, i32) {
    %c0_i32 = arith.constant 0 : i32
    %c0_i32_0 = arith.constant 0 : i32
    return %arg0, %c0_i32, %arg2 : i32, i32, i32
  }
  func.func @transform_4(%arg0: i32, %arg1: i32, %arg2: i32) -> (i32, i32, i32) {
    %c0_i32 = arith.constant 0 : i32
    %c0_i32_0 = arith.constant 0 : i32
    return %arg0, %c0_i32, %arg2 : i32, i32, i32
  }
  func.func @transform_5(%arg0: i32, %arg1: i32, %arg2: i32) -> (i32, i32) {
    %c0_i32 = arith.constant 0 : i32
    %c0_i32_0 = arith.constant 0 : i32
    %c0_i32_1 = arith.constant 0 : i32
    return %c0_i32, %c0_i32_0 : i32, i32
  }
  func.func @transform_6(%arg0: i32, %arg1: i32, %arg2: i32) -> (i32, i32) {
    %c0_i32 = arith.constant 0 : i32
    %c0_i32_0 = arith.constant 0 : i32
    %c0_i32_1 = arith.constant 0 : i32
    return %c0_i32, %c0_i32_0 : i32, i32
  }
  func.func @transform_7(%arg0: i32, %arg1: i32, %arg2: i32) -> (i32, i32) {
    %c0_i32 = arith.constant 0 : i32
    %c0_i32_0 = arith.constant 0 : i32
    %c0_i32_1 = arith.constant 0 : i32
    return %c0_i32, %c0_i32_0 : i32, i32
  }
  func.func @transform_8(%arg0: i32, %arg1: i32, %arg2: i32) -> (i32, i32) {
    %c0_i32 = arith.constant 0 : i32
    %c0_i32_0 = arith.constant 0 : i32
    %c0_i32_1 = arith.constant 0 : i32
    return %c0_i32, %c0_i32_0 : i32, i32
  }
  func.func @transform_9(%arg0: i32, %arg1: i32, %arg2: i32) -> (i32, i32) {
    %c0_i32 = arith.constant 0 : i32
    %c0_i32_0 = arith.constant 0 : i32
    %c0_i32_1 = arith.constant 0 : i32
    return %c0_i32, %c0_i32_0 : i32, i32
  }
  func.func @transform_10(%arg0: i32, %arg1: i32, %arg2: i32) -> (i32, i32) {
    %c0_i32 = arith.constant 0 : i32
    %c0_i32_0 = arith.constant 0 : i32
    %c0_i32_1 = arith.constant 0 : i32
    return %c0_i32, %c0_i32_0 : i32, i32
  }
  func.func @transform_11(%arg0: i32, %arg1: i32, %arg2: i32) -> (i32, i32) {
    %c0_i32 = arith.constant 0 : i32
    %c0_i32_0 = arith.constant 0 : i32
    %c0_i32_1 = arith.constant 0 : i32
    return %c0_i32, %c0_i32_0 : i32, i32
  }
  func.func @transform_12(%arg0: i32, %arg1: i32, %arg2: i32) -> (i32, i32, i32) {
    %c0_i32 = arith.constant 0 : i32
    return %arg0, %arg1, %arg2 : i32, i32, i32
  }
}

</mosaic_0001>

<bundles_post_ra>
// kernel: tpu_custom_call.1
= control target key start
LH: loop header
LB: loop body
LE: loop exit
PB: predicated region body
PF: predicated region fallthrough
CT: control target
= control target key end

     0   :  { %s2977_s0 = inlined_call_operand.hbm [shape: f32[2,16,128], index: 0, kind: input, shape index: {}]   ;;  %s2978_s1 = inlined_call_operand.vmem [shape: f32[2,16,8], index: 1, kind: input, shape index: {}]   ;;  %s2979_s2 = inlined_call_operand.vmem [shape: f32[2,16,1], index: 2, kind: input, shape index: {}]   ;;  %s2980_s3 = inlined_call_operand.hbm [shape: f32[2,1,128], index: 3, kind: input, shape index: {}]   ;;  %s2981_s4 = inlined_call_operand.hbm [shape: f32[2,1,128], index: 4, kind: input, shape index: {}]   ;;  %s2982_s5 = inlined_call_operand.hbm [shape: f32[8,128], index: 5, kind: input, shape index: {}]   ;;  %s2983_s6 = inlined_call_operand.vmem [shape: f32[128,16], index: 6, kind: input, shape index: {}]   ;;  %s2984_s7 = inlined_call_operand.hbm [shape: f32[16,128], index: 7, kind: input, shape index: {}]   ;;  %s2985_s8 = inlined_call_operand.vmem [shape: f32[128,256], index: 8, kind: input, shape index: {}]   ;;  %s2986_s9 = inlined_call_operand.vmem [shape: f32[1,256], index: 9, kind: input, shape index: {}]   ;;  %s2987_s10 = inlined_call_operand.hbm [shape: f32[256,128], index: 10, kind: input, shape index: {}]   ;;  %s2988_s11 = inlined_call_operand.vmem [shape: f32[1,128], index: 11, kind: input, shape index: {}]   ;;  %s2989_s12 = inlined_call_operand.hbm [shape: f32[2,16,128], index: 12, kind: output, shape index: {}]  }
   0x1   :  { %3018 = sst [smem:[#allocation29_spill]] %s2977_s0 }
   0x2   :  { %3019 = sst [smem:[#allocation30_spill]] %s2978_s1 }
   0x3   :  { %3020 = sst [smem:[#allocation31_spill]] %s2979_s2 }
   0x4   :  { %3021 = sst [smem:[#allocation32_spill]] %s2980_s3 }
   0x5   :  { %3022 = sst [smem:[#allocation33_spill]] %s2981_s4 }
   0x6   :  { %3023 = sst [smem:[#allocation34_spill]] %s2982_s5 }
   0x7   :  { %3024 = sst [smem:[#allocation35_spill]] %s2983_s6 }
   0x8   :  { %3025 = sst [smem:[#allocation36_spill]] %s2984_s7 }
   0x9   :  { %3026 = sst [smem:[#allocation37_spill]] %s2985_s8 }
   0xa   :  { %3027 = sst [smem:[#allocation38_spill]] %s2986_s9 }
   0xb   :  { %3028 = sst [smem:[#allocation39_spill]] %s2987_s10 }
   0xc   :  { %3029 = sst [smem:[#allocation40_spill]] %s2988_s11 }
   0xd   :  { %3030 = sst [smem:[#allocation41_spill]] %s2989_s12 }
   0xe   :  { %17 = vsyncpa [#allocation3], 0 }
   0xf   :  { %19 = vsyncpa [#allocation3 + $0x1], 0 }
  0x10   :  { %20 = vsyncpa [#allocation6], 0 }
  0x11   :  { %22 = vsyncpa [#allocation6 + $0x1], 0 }
  0x12   :  { %23 = vsyncpa [#allocation9], 0 }
  0x13   :  { %24 = vsyncpa [#allocation12], 0 }
  0x14   :  { %25 = vsyncpa [#allocation4], 0 }
  0x15   :  { %27 = vsyncpa [#allocation4 + $0x1], 0  ;;  %s2341_s21 = smov 0   ;;  %s2343_s22 = smov 0  }
  0x16   :  { %s2345_s23 = smov 0   ;;  %s2347_s24 = smov 0  }
  0x17   :  { %s2349_s25 = smov 0   ;;  %s2351_s26 = smov 0  }
  0x18   :  { %s2353_s27 = smov 0   ;;  %s2355_s28 = smov 0  }
  0x19   :  { %s2357_s29 = smov 0   ;;  %s2359_s30 = smov 0  }
  0x1a   :  { %s2361_s13 = smov 0  }
  0x1b LB: > { %3031 = sst [smem:[#allocation19_spill]] %s2225_s22  ;;  %s2397_s14 = sadd.s32 4294967295, %s2261_s13   ;;  %s2261_s13 = sphi %s2361_s13, %s33_s13   ;;  %s2257_s30 = sphi %s2359_s30, %s3095_s30   ;;  %s2253_s29 = sphi %s2357_s29, %s3094_s29   ;;  %s2249_s28 = sphi %s2355_s28, %s3101_s28   ;;  %s2245_s27 = sphi %s2353_s27, %s3092_s27   ;;  %s2241_s26 = sphi %s2351_s26, %s3100_s26   ;;  %s2237_s25 = sphi %s2349_s25, %s3099_s25   ;;  %s2233_s24 = sphi %s2347_s24, %s3098_s24   ;;  %s2229_s23 = sphi %s2345_s23, %s3097_s23   ;;  %s2225_s22 = sphi %s2343_s22, %s3096_s22   ;;  %s2221_s21 = sphi %s2341_s21, %s3091_s21  }
  0x1c   : > { %3032 = sst [smem:[#allocation20_spill]] %s2233_s24  ;;  %p1486_p0 = scmp.ge.s32.totalorder %s2261_s13, 1 }
  0x1d   : > { %3033 = sst [smem:[#allocation21_spill]] %s2245_s27  ;;  %p2993_p1 = scmp.eq.s32.totalorder %s2397_s14, 0 }
  0x1e   : > { %3034 = sst [smem:[#allocation22_spill]] %s2249_s28  ;;  %p376_p2 = scmp.lt.s32.totalorder %s2261_s13, 5 }
  0x1f   : > { %3035 = sst [smem:[#allocation23_spill]] %s2253_s29  ;;  %s2263_s16 = smov [#allocation8]  }
  0x20   : > { %3036 = sst [smem:[#allocation24_spill]] %s2257_s30  ;;  %p2402_p3 = pnand %p1486_p0, %p376_p2 }
  0x21   : > { %s389_s17 = sshll.u32 %s2263_s16, 4  ;;  %s3039_s5 = sld [smem:[#allocation34_spill]]  ;;  %s390_s17 = int_to_ptr.vmem [resolvable:$true] %s389_s17 }
  0x22   : > { %s3037_s15 = scalar_select %p2402_p3, 1, 0 }
  0x23   : > { %p1821_p4 = pneg %p2402_p3 }
  0x25   : > { %p2410_p5 = pnand %p1821_p4, %p2993_p1 }
  0x27   : > { %s3038_s18 = scalar_select %p2410_p5, 1, 0 }
  0x28   : > { %s1953_s12 = scalar_lea.hbm %s3039_s5, 128  ;;  %p2422_p7 = pneg %p2410_p5 }
  0x29   : > { %p1954_p6 = scmp.ne.s32.totalorder %s3039_s5, %s1953_s12  ;;  %p1960_p10 = scmp.lt.u32.totalorder %s1953_s12, %s3039_s5 }
  0x2b   : > { %p1956_p8 = pnand %p2422_p7, %p1954_p6 }
  0x2d   : > { %p1957_p9 = pneg %p1956_p8 }
  0x2f   : > { %p1962_p11 = pnand %p1960_p10, %p1957_p9 }
  0x31   : > { %1965 = shalt.err (!%p1962_p11)
}
  0x32   : > { %s1966_s19 = scalar_lea.vmem %s390_s17, 128  ;;  %p1974_p2 = scmp.lt.s32.totalorder %s390_s17, %s390_s17 }
  0x33   : > { %p1967_p12 = scmp.ne.s32.totalorder %s390_s17, %s1966_s19  ;;  %p1975_p4 = scmp.lt.s32.totalorder %s1966_s19, %s1966_s19 }
  0x35   : > { %p1969_p13 = pnand %p1967_p12, %p2422_p7  ;;  %p1976_p1 = por %p1975_p4, %p1974_p2 }
  0x37   : > { %p1970_p0 = pneg %p1969_p13 }
  0x39   : > { %p1977_p3 = pnand %p1976_p1, %p1970_p0 }
  0x3b   : > { %1980 = shalt.err (!%p1977_p3)
}
  0x3c   : > { %1824 = dma.hbm_to_vmem [thread:$0]  (!%p2410_p5), %s3039_s5, 128, %s390_s17, [#allocation9]  }
  0x3d   : > { %p2999_p1 = scmp.eq.s32.totalorder %s2261_s13, 0  ;;  %p154_p3 = scmp.ne.s32.totalorder %s2229_s23, %s2225_s22 }
  0x3e   : > { %p160_p6 = scmp.ne.s32.totalorder %s2225_s22, %s2221_s21  ;;  %p2998_p8 = scmp.lt.s32.totalorder %s2261_s13, 4 }
  0x3f   : > { %p156_p9 = por %p154_p3, %p2999_p1  ;;  %s481_s6 = sand.u32 1, %s2261_s13  }
  0x40   : > { %p3041_p10 = scmp.eq.s32.totalorder %s2397_s14, 0  ;;  %s2995_s12 = sand.u32 1, %s2229_s23  }
  0x41   : > { %s2996_s20 = sshll.u32 %s2257_s30, 4  ;;  %s3044_s3 = sld [smem:[#allocation32_spill]] }
  0x42   : > { %p2449_p11 = por %p160_p6, %p3041_p10  ;;  %s484_s21 = scalar_lea.vmem [#allocation5], %s2995_s12 }
  0x43   : > { %s492_s17 = sshll.u32 %s484_s21, 4  ;;  %p2466_p12 = pnand %p2998_p8, %p156_p9  ;;  %s2471_s17 = int_to_ptr.vmem [resolvable:$true] %s492_s17 }
  0x44   : > { %s3042_s8 = scalar_select %p2449_p11, 1, 0 }
  0x45   : > { %s3045_s5 = scalar_select %p2466_p12, 1, 0 }
  0x46   : > { %3043 = sst [smem:[#allocation25_spill]] %s3042_s8  ;;  %s2473_s19 = scalar_lea.sflag [#allocation6], %s481_s6 }
  0x47   : > { %s2460_s11 = scalar_lea.hbm %s3044_s3, %s2996_s20  ;;  %p3003_p0 = pneg %p2466_p12 }
  0x48   : > { %s1981_s9 = scalar_lea.hbm %s2460_s11, 16  ;;  %s1986_s20 = scalar_lea.hbm %s3044_s3, 32 }
  0x49   : > { %p1982_p13 = scmp.ne.s32.totalorder %s2460_s11, %s1981_s9  ;;  %p1987_p3 = scmp.lt.u32.totalorder %s2460_s11, %s3044_s3 }
  0x4a   : > { %p1988_p6 = scmp.lt.u32.totalorder %s1986_s20, %s1981_s9  ;;  %p1990_p10 = scmp.lt.u32.totalorder %s1981_s9, %s2460_s11 }
  0x4b   : > { %p1984_p2 = pnand %p3003_p0, %p1982_p13 }
  0x4c   : > { %p1989_p9 = por %p1988_p6, %p1987_p3 }
  0x4d   : > { %p1985_p4 = pneg %p1984_p2 }
  0x4e   : > { %p1991_p8 = por %p1990_p10, %p1989_p9 }
  0x50   : > { %p1992_p1 = pnand %p1991_p8, %p1985_p4 }
  0x52   : > { %1995 = shalt.err (!%p1992_p1)
}
  0x53   : > { %s1996_s6 = scalar_lea.vmem %s2471_s17, 16  ;;  %s2264_s12 = smov [#allocation5]  }
  0x54   : > { %p1997_p13 = scmp.ne.s32.totalorder %s2471_s17, %s1996_s6  ;;  %s2001_s21 = sshll.u32 %s2264_s12, 4  ;;  %s2002_s21 = int_to_ptr.vmem [resolvable:$false] %s2001_s21 }
  0x55   : > { %s2003_s1 = scalar_lea.vmem %s2002_s21, 32  ;;  %p2004_p5 = scmp.lt.s32.totalorder %s2471_s17, %s2002_s21 }
  0x56   : > { %p1999_p2 = pnand %p1997_p13, %p3003_p0  ;;  %p2005_p3 = scmp.lt.s32.totalorder %s2003_s1, %s1996_s6 }
  0x58   : > { %p2000_p11 = pneg %p1999_p2  ;;  %p2006_p6 = por %p2005_p3, %p2004_p5 }
  0x5a   : > { %p2007_p9 = pnand %p2006_p6, %p2000_p11 }
  0x5c   : > { %2010 = shalt.err (!%p2007_p9)
}
  0x5d   : > { %1837 = dma.hbm_to_vmem [thread:$0]  (!%p2466_p12), %s2460_s11, 16, %s2471_s17, %s2473_s19  }
  0x5e   : > { %s2265_s27 = smov [#allocation10]   ;;  %s3046_s7 = sld [smem:[#allocation36_spill]] }
  0x5f   : > { %s402_s20 = sshll.u32 %s2265_s27, 4  ;;  %s403_s20 = int_to_ptr.vmem [resolvable:$true] %s402_s20 }
  0x64   : > { %s2011_s12 = scalar_lea.hbm %s3046_s7, 256 }
  0x65   : > { %p2012_p5 = scmp.ne.s32.totalorder %s3046_s7, %s2011_s12  ;;  %p2018_p11 = scmp.lt.u32.totalorder %s2011_s12, %s3046_s7 }
  0x67   : > { %p2014_p1 = pnand %p2012_p5, %p2422_p7 }
  0x69   : > { %p2015_p8 = pneg %p2014_p1 }
  0x6b   : > { %p2020_p4 = pnand %p2018_p11, %p2015_p8 }
  0x6d   : > { %2023 = shalt.err (!%p2020_p4)
}
  0x6e   : > { %s2024_s11 = scalar_lea.vmem %s403_s20, 256  ;;  %p2032_p3 = scmp.lt.s32.totalorder %s403_s20, %s403_s20 }
  0x6f   : > { %p2025_p10 = scmp.ne.s32.totalorder %s403_s20, %s2024_s11  ;;  %p2033_p6 = scmp.lt.s32.totalorder %s2024_s11, %s2024_s11 }
  0x71   : > { %p2027_p13 = pnand %p2025_p10, %p2422_p7  ;;  %p2034_p9 = por %p2033_p6, %p2032_p3 }
  0x73   : > { %p2028_p2 = pneg %p2027_p13 }
  0x75   : > { %p2035_p0 = pnand %p2034_p9, %p2028_p2 }
  0x77   : > { %2038 = shalt.err (!%p2035_p0)
}
  0x78   : > { %s2266_s2 = smov 128   ;;  %s2267_s3 = smov 8  }
  0x79   : > { %p3047_p5 = scmp.ne.s32.totalorder %s3038_s18, 0  ;;  %s2268_s9 = smov [#allocation11]  }
  0x7a   : > { %s421_s12 = sshll.u32 %s2268_s9, 4  ;;  %s3048_s10 = sld [smem:[#allocation39_spill]]  ;;  %s422_s12 = int_to_ptr.vmem [resolvable:$true] %s421_s12 }
  0x7b   : > { %1827 = dma.hbm_to_vmem [thread:$0]  (!%p3047_p5), %s3046_s7, 256, %s403_s20, [#allocation9], %s2266_s2, %s2266_s2, %s2267_s3  }
  0x80   : > { %s2039_s1 = scalar_lea.hbm %s3048_s10, 4096 }
  0x81   : > { %p2040_p0 = scmp.ne.s32.totalorder %s3048_s10, %s2039_s1  ;;  %p2046_p11 = scmp.lt.u32.totalorder %s2039_s1, %s3048_s10 }
  0x83   : > { %p2042_p1 = pnand %p2040_p0, %p2422_p7 }
  0x85   : > { %p2043_p8 = pneg %p2042_p1 }
  0x87   : > { %p2048_p4 = pnand %p2046_p11, %p2043_p8 }
  0x89   : > { %2051 = shalt.err (!%p2048_p4)
}
  0x8a   : > { %s2052_s20 = scalar_lea.vmem %s422_s12, 4096  ;;  %p2060_p3 = scmp.lt.s32.totalorder %s422_s12, %s422_s12 }
  0x8b   : > { %p2053_p10 = scmp.ne.s32.totalorder %s422_s12, %s2052_s20  ;;  %p2061_p6 = scmp.lt.s32.totalorder %s2052_s20, %s2052_s20 }
  0x8d   : > { %p2055_p13 = pnand %p2053_p10, %p2422_p7  ;;  %p2062_p9 = por %p2061_p6, %p2060_p3 }
  0x8f   : > { %p2056_p2 = pneg %p2055_p13 }
  0x91   : > { %p2063_p12 = pnand %p2062_p9, %p2056_p2 }
  0x93   : > { %2066 = shalt.err (!%p2063_p12)
}
  0x94   : > { %1830 = dma.hbm_to_vmem [thread:$0]  (!%p3047_p5), %s3048_s10, 4096, %s422_s12, [#allocation12], %s2266_s2, %s2266_s2, %s2267_s3  }
  0x95   : > { %s1485_s22 = sadd.s32 4294967294, %s2261_s13   ;;  %s48_s16 = sadd.s32 1, %s2253_s29 }
  0x96   : > { %p50_p7 = scmp.ge.s32.totalorder %s48_s16, 2  ;;  %s52_s18 = sadd.s32 1, %s2257_s30 }
  0x97   : > { %s63_s8 = sadd.s32 1, %s2241_s26  ;;  %p70_p12 = scmp.ne.s32.totalorder %s2241_s26, %s2237_s25 }
  0x98   : > { %s3103_s16 = smov (%p50_p7, %s48_s16), 0  ;;  %s3105_s18 = smov (!%p50_p7, %s52_s18), %s2257_s30 }
  0x99   : > { %3049 = sst [smem:[#allocation26_spill]] %s3103_s16  ;;  %s57_s27 = ssub.s32 %s2253_s29, %s3103_s16 }
  0x9a   : > { %p3050_p0 = scmp.eq.s32.totalorder %s2261_s13, 0  ;;  %p54_p5 = scmp.ge.s32.totalorder %s3105_s18, 2 }
  0x9b   : > { %p76_p8 = scmp.ne.s32.totalorder %s2237_s25, %s2233_s24  ;;  %p363_p11 = scmp.eq.s32.totalorder %s2397_s14, 3 }
  0x9c   : > { %p2550_p1 = por %p3050_p0, %p70_p12  ;;  %p369_p4 = scmp.eq.s32.totalorder %s1485_s22, 3 }
  0x9d   : > { %s3107_s18 = smov (%p54_p5, %s3105_s18), 0  ;;  %p3053_p10 = scmp.eq.s32.totalorder %s2397_s14, 0 }
  0x9e   : > { %3052 = sst [smem:[#allocation27_spill]] %s3107_s18  ;;  %p2565_p2 = por %p363_p11, %p70_p12 }
  0x9f   : > { %p2561_p13 = por %p3053_p10, %p76_p8  ;;  %s56_s12 = ssub.s32 %s2257_s30, %s3107_s18 }
  0xa0   : > { %s3055_s9 = scalar_select %p2565_p2, 1, 0 }
  0xa1   : > { %p2571_p3 = por %p369_p4, %p76_p8  ;;  %s58_s6 = sor.u32 %s57_s27, %s56_s12 }
  0xa2   : > { %p145_p6 = scmp.eq.s32.totalorder %s56_s12, 0  ;;  %p61_p9 = scmp.eq.s32.totalorder %s58_s6, 0 }
  0xa3   : > { %s3056_s21 = scalar_select %p2571_p3, 1, 0 }
  0xa4   : > { %s438_s1 = sand.u32 1, %s2241_s26   ;;  %s3058_s11 = sadd.s32 1, %s2229_s23 }
  0xa5   : > { %3057 = sst [smem:[#allocation28_spill]] %s3056_s21  ;;  %s1491_s17 = sshll.u32 %s438_s1, 3 }
  0xa6   : > { %s2579_s20 = scalar_select %p145_p6, %s2229_s23, %s3058_s11  }
  0xa7   : > { %s2582_s28 = scalar_select %p61_p9, %s2241_s26, %s63_s8  }
  0xa8   : > { %s1492_s22 = sshll.u32 %s2257_s30, 1  ;;  %s442_s10 = scalar_lea.vmem [#allocation2], %s1491_s17 }
  0xa9   : > { %s448_s7 = sadd.s32 %s2253_s29, %s1492_s22  ;;  %s452_s18 = sshll.u32 %s442_s10, 4  ;;  %s2586_s18 = int_to_ptr.vmem [resolvable:$true] %s452_s18 }
  0xaa   : > { %s1493_s16 = sshll.u32 %s448_s7, 7  ;;  %s3059_s0 = sld [smem:[#allocation29_spill]] }
  0xab   : > { %p3060_p7 = scmp.lt.s32.totalorder %s2261_s13, 4  ;;  %s3062_s12 = sshll.u32 %s2257_s30, 4 }
  0xac   : > { %s3063_s4 = sld [smem:[#allocation33_spill]]  ;;  %s3064_s24 = sand.u32 1, %s2229_s23  }
  0xad   : > { %p2597_p12 = pnand %p3060_p7, %p2550_p1  ;;  %s439_s21 = scalar_lea.sflag [#allocation3], %s438_s1 }
  0xaf   : > { %p2069_p1 = pneg %p2597_p12 }
  0xb0   : > { %s2591_s27 = scalar_lea.hbm %s3059_s0, %s1493_s16  ;;  %s502_s16 = scalar_lea.vmem [#allocation7], %s3064_s24 }
  0xb1   : > { %s510_s2 = sshll.u32 %s502_s16, 4  ;;  %s2067_s11 = scalar_lea.hbm %s2591_s27, 128  ;;  %s2610_s2 = int_to_ptr.vmem [resolvable:$true] %s510_s2 }
  0xb2   : > { %s2606_s6 = scalar_lea.hbm %s3063_s4, %s3062_s12  ;;  %p2068_p0 = scmp.ne.s32.totalorder %s2591_s27, %s2067_s11 }
  0xb3   : > { %s2072_s10 = scalar_lea.hbm %s3059_s0, 512  ;;  %p2073_p11 = scmp.lt.u32.totalorder %s2591_s27, %s3059_s0 }
  0xb4   : > { %p2070_p5 = pnand %p2069_p1, %p2068_p0  ;;  %p2074_p4 = scmp.lt.u32.totalorder %s2072_s10, %s2067_s11 }
  0xb5   : > { %p2076_p6 = scmp.lt.u32.totalorder %s2067_s11, %s2591_s27 }
  0xb6   : > { %p2071_p8 = pneg %p2070_p5  ;;  %p2075_p10 = por %p2074_p4, %p2073_p11 }
  0xb8   : > { %p2077_p9 = por %p2076_p6, %p2075_p10 }
  0xba   : > { %p2078_p7 = pnand %p2077_p9, %p2071_p8 }
  0xbc   : > { %2081 = shalt.err (!%p2078_p7)
}
  0xbd   : > { %s2082_s1 = scalar_lea.vmem %s2586_s18, 128  ;;  %s2269_s24 = smov [#allocation2]  }
  0xbe   : > { %p2083_p0 = scmp.ne.s32.totalorder %s2586_s18, %s2082_s1  ;;  %s2087_s16 = sshll.u32 %s2269_s24, 4  ;;  %s2088_s16 = int_to_ptr.vmem [resolvable:$false] %s2087_s16 }
  0xbf   : > { %s2089_s17 = scalar_lea.vmem %s2088_s16, 256  ;;  %p2090_p2 = scmp.lt.s32.totalorder %s2586_s18, %s2088_s16 }
  0xc0   : > { %p2085_p5 = pnand %p2083_p0, %p2069_p1  ;;  %p2091_p11 = scmp.lt.s32.totalorder %s2089_s17, %s2082_s1 }
  0xc2   : > { %p2086_p3 = pneg %p2085_p5  ;;  %p2092_p4 = por %p2091_p11, %p2090_p2 }
  0xc4   : > { %p2093_p10 = pnand %p2092_p4, %p2086_p3 }
  0xc6   : > { %2096 = shalt.err (!%p2093_p10)
}
  0xc7   : > { %1834 = dma.hbm_to_vmem [thread:$0]  (!%p2597_p12), %s2591_s27, 128, %s2586_s18, %s439_s21  }
  0xc8   : > { %s2097_s11 = scalar_lea.hbm %s2606_s6, 16  ;;  %p3065_p8 = scmp.ne.s32.totalorder %s3045_s5, 0 }
  0xc9   : > { %p2098_p1 = scmp.ne.s32.totalorder %s2606_s6, %s2097_s11  ;;  %s2102_s12 = scalar_lea.hbm %s3063_s4, 32 }
  0xca   : > { %p3066_p6 = pneg %p3065_p8  ;;  %p2103_p2 = scmp.lt.u32.totalorder %s2606_s6, %s3063_s4 }
  0xcb   : > { %p2104_p3 = scmp.lt.u32.totalorder %s2102_s12, %s2097_s11  ;;  %p2106_p5 = scmp.lt.u32.totalorder %s2097_s11, %s2606_s6 }
  0xcc   : > { %p2100_p9 = pnand %p2098_p1, %p3066_p6 }
  0xcd   : > { %p2105_p0 = por %p2104_p3, %p2103_p2 }
  0xce   : > { %p2101_p7 = pneg %p2100_p9 }
  0xcf   : > { %p2107_p11 = por %p2106_p5, %p2105_p0 }
  0xd1   : > { %p2108_p4 = pnand %p2107_p11, %p2101_p7 }
  0xd3   : > { %2111 = shalt.err (!%p2108_p4)
}
  0xd4   : > { %s2112_s18 = scalar_lea.vmem %s2610_s2, 16  ;;  %p3067_p10 = pmov %p3066_p6 }
  0xd5   : > { %p2113_p12 = scmp.ne.s32.totalorder %s2610_s2, %s2112_s18  ;;  %s2270_s27 = smov [#allocation7]  }
  0xd6   : > { %s2117_s21 = sshll.u32 %s2270_s27, 4  ;;  %s2118_s21 = int_to_ptr.vmem [resolvable:$false] %s2117_s21 }
  0xd7   : > { %p2115_p1 = pnand %p2113_p12, %p3067_p10  ;;  %s2119_s1 = scalar_lea.vmem %s2118_s21, 32 }
  0xd8   : > { %p2120_p9 = scmp.lt.s32.totalorder %s2610_s2, %s2118_s21  ;;  %p2121_p2 = scmp.lt.s32.totalorder %s2119_s1, %s2112_s18 }
  0xd9   : > { %p2116_p6 = pneg %p2115_p1 }
  0xda   : > { %p2122_p3 = por %p2121_p2, %p2120_p9 }
  0xdc   : > { %p2123_p0 = pnand %p2122_p3, %p2116_p6 }
  0xde   : > { %2126 = shalt.err (!%p2123_p0)
}
  0xdf   : > { %1840 = dma.hbm_to_vmem [thread:$0]  (!%p3065_p8), %s2606_s6, 16, %s2610_s2, %s2473_s19  }
  0xe0   : > { %p3068_p7 = scmp.ne.s32.totalorder %s3037_s15, 0 }
  0xe1   : > { %s2664_s24 = sand.u32 (!%p3068_p7), 1, %s2237_s25  }
  0xe2   : > { %519 = sbr.rel (%p3068_p7) target bundleno = 1801 (0x709), region = 68  ;;  %s3015_s16 = sshll.u32 (!%p3068_p7), %s2664_s24, 3 }
  0xe3   : > { %s522_s17 = scalar_lea.sflag (!%p3068_p7), [#allocation3], %s2664_s24  ;;  %s2670_s11 = scalar_lea.vmem (!%p3068_p7), [#allocation2], %s3015_s16 }
  0xe9   : > { %2200 = dma.done.wait (%p2561_p13), %s522_s17, 128  }
  0xea   : > { %2202 = vsyncadd (%p2561_p13), %s522_s17, 4294967168  ;;  %s3069_s5 = sld [smem:[#allocation19_spill]]  ;;  %s530_s19 = sand.u32 1, %s2397_s14  }
  0xeb   : > { %s3070_s15 = sld [smem:[#allocation25_spill]]  ;;  %s531_s2 = scalar_lea.sflag [#allocation6], %s530_s19 }
  0xf0   : > { %s532_s6 = sand.u32 1, %s3069_s5  }
  0xf1   : > { %s2678_s22 = scalar_lea.vmem [#allocation5], %s532_s6  ;;  %p3071_p8 = scmp.ne.s32.totalorder %s3070_s15, 0 }
  0xf3   : > { %2204 = dma.done.wait (%p3071_p8), %s531_s2, 32  }
  0xf4   : > { %2206 = vsyncadd (%p3071_p8), %s531_s2, 4294967264  ;;  %s2684_s10 = scalar_lea.vmem [#allocation7], %s532_s6  ;;  %p3072_p5 = scmp.eq.s32.totalorder %s2397_s14, 0 }
  0xf6   : > { %2208 = dma.done.wait (%p3072_p5), [#allocation9], 384   ;;  %p3073_p13 = pmov %p3072_p5 }
  0xf7   : > { %p3074_p11 = pmov %p3072_p5 }
  0xf8   : > { %2210 = vsyncadd (%p3073_p13), [#allocation9], 4294966912 }
  0xf9   : > { %2212 = dma.done.wait (%p3074_p11), [#allocation12], 4096   ;;  %p3075_p4 = pmov %p3072_p5 }
  0xfa   : > { %s3076_s3 = sld [smem:[#allocation22_spill]]  ;;  %s3077_s12 = sld [smem:[#allocation21_spill]]  ;;  %v2271_v0 = vmov 0.0   ;;  %vm2272_vm0 = vmmov 0   ;;  %v2273_v1 = vmov 0   ;;  %v2274_v2 = vmov 0.0|0.0  }
  0xfb   : > { %2214 = vsyncadd (%p3075_p4), [#allocation12], 4294963200  ;;  %1594 = vmatprep.subr.mxu0 %v2271_v0  ;;  %1596 = vmatprep.mubr.msk.f32.mxu0 %vm2272_vm0, %v2271_v0  ;;  %vm637_vm1 = vcmask 64512   ;;  %v636_v3 = vld [vmem:[#allocation8] sm:$0xff]  ;;  %s3078_s17 = sld [smem:[#allocation30_spill]]  ;;  %s3079_s6 = sld [smem:[#allocation31_spill]] }
  0xfc   : > { %1950 = vset.pattern.permute.xlu0 %v2273_v1  ;;  %1683 = vmatprep.subr.bf16.mxu1 %v2274_v2  ;;  %s3080_s4 = sld [smem:[#allocation35_spill]]  ;;  %v727_v30 = vld [vmem:[#allocation10] sm:$0xff]  ;;  %v728_v31 = vld [vmem:[#allocation10 + $0x8] sm:$0xff]  ;;  %vm889_vm2 = vcmask 130048   ;;  %s3083_s29 = sld [smem:[#allocation40_spill]] }
  0xfd   : > { %1631 = vmatprep.mubr.msk.f32.mxu1 %vm2272_vm0, %v2271_v0  ;;  %1595 = vmatpush3.msra.mxu0 %v636_v3  ;;  %v1708_v32 = vpack.c.bf16 %v728_v31, %v727_v30  ;;  %v795_v33 = vld [vmem:[%s2670_s11] sm:$0xff]  ;;  %p3087_p6 = scmp.ne.s32.totalorder %s3055_s9, 0  ;;  %s2275_s19 = smov [#allocation13]  }
  0xfe   : > { %1707 = vmatprep.subr.bf16.mxu0 %v2274_v2  ;;  %v1508_v34 = vld [vmem:[%s2678_s22] ss:$0 sm:$0xff]  ;;  %s3085_s22 = sld [smem:[#allocation41_spill]] }
  0xff   : > { %v1507_v35 = vld [vmem:[%s2684_s10] ss:$0 sm:$0xff]  ;;  %v816_v37 = vadd.f32 %v1508_v34, %v795_v33  ;;  %s3081_s10 = sld [smem:[#allocation37_spill]] }
 0x100   : > { %p618_p12 = scmp.lt.s32.totalorder %s3076_s3, 1  ;;  %p620_p10 = scmp.lt.s32.totalorder %s3077_s12, 1 }
 0x102   : > { %s619_s7 = scalar_select %p618_p12, %s3076_s3, 1  ;;  %v711_v4 = vld [vmem:[%s3080_s4] sm:$0xff]  ;;  %v712_v5 = vld [vmem:[%s3080_s4 + $0x8] sm:$0xff]  ;;  %v713_v9 = vld [vmem:[%s3080_s4 + $0x10] sm:$0xff] }
 0x103   : > { %s621_s14 = scalar_select %p620_p10, %s3077_s12, 1  ;;  %v2716_v8 = vpack.c.bf16 %v712_v5, %v711_v4  ;;  %v714_v10 = vld [vmem:[%s3080_s4 + $0x18] sm:$0xff]  ;;  %v715_v12 = vld [vmem:[%s3080_s4 + $0x20] sm:$0xff]  ;;  %v716_v13 = vld [vmem:[%s3080_s4 + $0x28] sm:$0xff] }
 0x104   : > { %s1502_s8 = sshll.u32 %s619_s7, 1  ;;  %v1687_v11 = vpack.c.bf16 %v714_v10, %v713_v9  ;;  %v1690_v14 = vpack.c.bf16 %v716_v13, %v715_v12  ;;  %v717_v15 = vld [vmem:[%s3080_s4 + $0x30] sm:$0xff]  ;;  %v718_v16 = vld [vmem:[%s3080_s4 + $0x38] sm:$0xff]  ;;  %v719_v18 = vld [vmem:[%s3080_s4 + $0x40] sm:$0xff] }
 0x105   : > { %s623_s18 = sadd.s32 %s1502_s8, %s621_s14  ;;  %1685 = vmatpush3.bf16.msra.mxu1 %v2716_v8  ;;  %v1693_v17 = vpack.c.bf16 %v718_v16, %v717_v15  ;;  %v720_v19 = vld [vmem:[%s3080_s4 + $0x48] sm:$0xff]  ;;  %v721_v21 = vld [vmem:[%s3080_s4 + $0x50] sm:$0xff]  ;;  %v722_v22 = vld [vmem:[%s3080_s4 + $0x58] sm:$0xff]  ;;  %s3082_s14 = sld [smem:[#allocation38_spill]] }
 0x106   : > { %s1503_s27 = sshll.u32 %s623_s18, 3  ;;  %1686 = vmatprep.subr.bf16.mxu1 %v2274_v2  ;;  %v1696_v20 = vpack.c.bf16 %v720_v19, %v719_v18  ;;  %v1699_v23 = vpack.c.bf16 %v722_v22, %v721_v21  ;;  %v723_v24 = vld [vmem:[%s3080_s4 + $0x60] sm:$0xff]  ;;  %v724_v25 = vld [vmem:[%s3080_s4 + $0x68] sm:$0xff]  ;;  %v725_v27 = vld [vmem:[%s3080_s4 + $0x70] sm:$0xff]  ;;  %s1513_s8 = sshll.u32 %s3076_s3, 1 }
 0x107   : > { %s625_s5 = scalar_lea.vmem %s3078_s17, %s1503_s27  ;;  %s633_s2 = scalar_lea.vmem %s3079_s6, %s1503_s27  ;;  %v1702_v26 = vpack.c.bf16 %v724_v25, %v723_v24  ;;  %v726_v28 = vld [vmem:[%s3080_s4 + $0x78] sm:$0xff]  ;;  %v730_v49 = vld [vmem:[%s3081_s10 + $0x8] sm:$0xff]  ;;  %v729_v55 = vld [vmem:[%s3081_s10] sm:$0xff] }
 0x108   : > { %v635_v6 = vld [vmem:[%s625_s5] sm:$0xff]  ;;  %v1705_v29 = vpack.c.bf16 %v726_v28, %v725_v27  ;;  %v732_v50 = vld [vmem:[%s3081_s10 + $0x18] sm:$0xff]  ;;  %v731_v56 = vld [vmem:[%s3081_s10 + $0x10] sm:$0xff]  ;;  %s1286_s30 = sadd.s32 %s3077_s12, %s1513_s8  ;;  %s3084_s27 = sshll.u32 %s2664_s24, 3 }
 0x109   : > { %v634_v7 = vld [vmem:[%s633_s2] sm:$0xff]  ;;  %1597 = vmatmul.mubr.msk.f32.vlgmr.msra.gmra.mrb[0].mxu0 %vm637_vm1, %v635_v6  ;;  %1688 = vmatpush3.bf16.msra.mxu1 %v1687_v11  ;;  %v1737_v51 = vpack.c.bf16 %v732_v50, %v730_v49  ;;  %v734_v57 = vld [vmem:[%s3081_s10 + $0x28] sm:$0xff]  ;;  %v736_v58 = vld [vmem:[%s3081_s10 + $0x38] sm:$0xff]  ;;  %v1739_v59 = vpack.c.bf16 %v731_v56, %v729_v55  ;;  %s1514_s16 = sshll.u32 %s1286_s30, 7  ;;  %s617_s21 = scalar_lea.vmem [#allocation13], %s3084_s27 }
 0x10a   : > { %800 = vperm.xlu0 %1950, %v634_v7   ;;  %1638 = vmatprep.mubr.msk.f32.mxu0 %vm2272_vm0, %v2271_v0  ;;  %v1741_v60 = vpack.c.bf16 %v736_v58, %v734_v57  ;;  %v733_v61 = vld [vmem:[%s3081_s10 + $0x20] sm:$0xff]  ;;  %v735_v62 = vld [vmem:[%s3081_s10 + $0x30] sm:$0xff]  ;;  %v738_v1 = vld [vmem:[%s3081_s10 + $0x48] sm:$0xff]  ;;  %s1290_s1 = sshll.u32 %s617_s21, 4  ;;  %s3086_s17 = smov %s3085_s22  ;;  %s2916_s1 = int_to_ptr.vmem [resolvable:$true] %s1290_s1 }
 0x10b   : > { %1689 = vmatprep.subr.bf16.mxu1 %v2274_v2  ;;  %1709 = vmatpush3.bf16.msra.mxu0 %v1708_v32  ;;  %v1743_v3 = vpack.c.bf16 %v735_v62, %v733_v61  ;;  %v737_v5 = vld [vmem:[%s3081_s10 + $0x40] sm:$0xff]  ;;  %v739_v6 = vld [vmem:[%s3081_s10 + $0x50] sm:$0xff]  ;;  %v742_v7 = vld [vmem:[%s3081_s10 + $0x68] sm:$0xff]  ;;  %s2914_s5 = scalar_lea.hbm %s3085_s22, %s1514_s16  ;;  %s1274_s12 = scalar_lea.sflag [#allocation4], %s2664_s24 }
 0x10c   : > { %1710 = vmatprep.subr.bf16.mxu0 %v2274_v2  ;;  %v741_v10 = vld [vmem:[%s3081_s10 + $0x60] sm:$0xff]  ;;  %v746_v12 = vld [vmem:[%s3081_s10 + $0x88] sm:$0xff]  ;;  %v748_v13 = vld [vmem:[%s3081_s10 + $0x98] sm:$0xff]  ;;  %s2127_s15 = scalar_lea.vmem %s2916_s1, 128  ;;  %s2131_s6 = sshll.u32 %s2275_s19, 4  ;;  %s2132_s6 = int_to_ptr.vmem [resolvable:$false] %s2131_s6 }
 0x10d   : > { %1691 = vmatpush3.bf16.msra.mxu1 %v1690_v14  ;;  %v1753_v15 = vpack.c.bf16 %v748_v13, %v746_v12  ;;  %v745_v16 = vld [vmem:[%s3081_s10 + $0x80] sm:$0xff]  ;;  %v750_v18 = vld [vmem:[%s3081_s10 + $0xa8] sm:$0xff]  ;;  %v752_v19 = vld [vmem:[%s3081_s10 + $0xb8] sm:$0xff]  ;;  %p2128_p1 = scmp.ne.s32.totalorder %s2916_s1, %s2127_s15  ;;  %s2133_s2 = scalar_lea.vmem %s2132_s6, 256 }
 0x10e   : > { %1692 = vmatprep.subr.bf16.mxu1 %v2274_v2  ;;  %v1757_v21 = vpack.c.bf16 %v752_v19, %v750_v18  ;;  %v749_v22 = vld [vmem:[%s3081_s10 + $0xa0] sm:$0xff]  ;;  %v754_v24 = vld [vmem:[%s3081_s10 + $0xc8] sm:$0xff]  ;;  %v756_v25 = vld [vmem:[%s3081_s10 + $0xd8] sm:$0xff]  ;;  %p2134_p3 = scmp.lt.s32.totalorder %s2916_s1, %s2132_s6  ;;  %p2135_p0 = scmp.lt.s32.totalorder %s2133_s2, %s2127_s15 }
 0x10f   : > { %v1761_v27 = vpack.c.bf16 %v756_v25, %v754_v24  ;;  %v753_v28 = vld [vmem:[%s3081_s10 + $0xc0] sm:$0xff]  ;;  %v758_v30 = vld [vmem:[%s3081_s10 + $0xe8] sm:$0xff]  ;;  %v760_v31 = vld [vmem:[%s3081_s10 + $0xf8] sm:$0xff]  ;;  %p2129_p9 = pnand %p2128_p1, %p3087_p6 }
 0x110   : > { %v1765_v33 = vpack.c.bf16 %v760_v31, %v758_v30  ;;  %v757_v34 = vld [vmem:[%s3081_s10 + $0xe0] sm:$0xff]  ;;  %v766_v55 = vld [vmem:[#allocation11 + $0x20] sm:$0xff]  ;;  %v767_v56 = vld [vmem:[#allocation11 + $0x28] sm:$0xff]  ;;  %p2136_p7 = por %p2135_p0, %p2134_p3 }
 0x111   : > { %1694 = vmatpush3.bf16.msra.mxu1 %v1693_v17  ;;  %v764_v49 = vld [vmem:[#allocation11 + $0x10] sm:$0xff]  ;;  %v765_v50 = vld [vmem:[#allocation11 + $0x18] sm:$0xff]  ;;  %v791_v12 = vld [vmem:[#allocation11 + $0xe8] sm:$0xff]  ;;  %p2130_p2 = pneg %p2129_p9 }
 0x112   : > { %1695 = vmatprep.subr.bf16.mxu1 %v2274_v2  ;;  %v784_v57 = vld [vmem:[#allocation11 + $0xb0] sm:$0xff]  ;;  %v785_v58 = vld [vmem:[#allocation11 + $0xb8] sm:$0xff]  ;;  %v774_v18 = vld [vmem:[#allocation11 + $0x60] sm:$0xff] }
 0x113   : > { %v768_v61 = vld [vmem:[#allocation11 + $0x30] sm:$0xff]  ;;  %v769_v62 = vld [vmem:[#allocation11 + $0x38] sm:$0xff]  ;;  %v775_v19 = vld [vmem:[#allocation11 + $0x68] sm:$0xff]  ;;  %p2137_p8 = pnand %p2136_p7, %p2130_p2 }
 0x114   : > { %v776_v24 = vld [vmem:[#allocation11 + $0x70] sm:$0xff]  ;;  %v777_v25 = vld [vmem:[#allocation11 + $0x78] sm:$0xff] }
 0x115   : > { %1697 = vmatpush3.bf16.msra.mxu1 %v1696_v20 }
 0x116   : > { %1698 = vmatprep.subr.bf16.mxu1 %v2274_v2 }
 0x119   : > { %1700 = vmatpush3.bf16.msra.mxu1 %v1699_v23 }
 0x11a   : > { %1701 = vmatprep.subr.bf16.mxu1 %v2274_v2 }
 0x11d   : > { %1703 = vmatpush3.bf16.msra.mxu1 %v1702_v26 }
 0x11e   : > { %1704 = vmatprep.subr.bf16.mxu1 %v2274_v2 }
 0x121   : > { %1706 = vmatpush3.bf16.msra.mxu1 %v1705_v29 }
 0x122   : > { %1734 = vmatprep.subr.bf16.mxu1 %v2274_v2 }
 0x189   : > { %v801_v36 = vpop.permute.xlu0 %800 }
 0x18a   : > { %v2776_v38 = vmul.f32 %v1507_v35, %v801_v36  ;;  %v759_v35 = vld [vmem:[%s3081_s10 + $0xf0] sm:$0xff] }
 0x18b   : > { %v1767_v36 = vpack.c.bf16 %v759_v35, %v757_v34 }
 0x1dc   : > { %v707_v39 = vpop.f32.mrb[0].mxu0 }
 0x1dd   : > { %v817_v40 = vadd.f32 %v816_v37, %v707_v39  ;;  %v1598_v41 = vpop.f32.mrb[1].mxu0  ;;  %v778_v37 = vld [vmem:[#allocation11 + $0x80] sm:$0xff]  ;;  %v779_v39 = vld [vmem:[#allocation11 + $0x88] sm:$0xff] }
 0x1de   : > { %v1769_v41 = vpack.c.bf16 %v779_v39, %v778_v37 }
 0x1df   : > { %v2779_v42 = vmul.f32 %v817_v40, %v2776_v38  ;;  %v762_v40 = vld [vmem:[#allocation11] sm:$0xff] }
 0x1e1   : > { %1632 = vmatmul.mubr.f32.vlgmr.msra.gmra.mrb[0].mxu1 %v2779_v42 }
 0x1e2   : > { %1736 = vmatpush3.bf16.msra.mxu1 %v1708_v32  ;;  %1680 = vmatprep.mubr.msk.f32.mxu1 %vm2272_vm0, %v2271_v0 }
 0x1e3   : > { %1738 = vmatprep.subr.bf16.mxu1 %v1737_v51  ;;  %v782_v51 = vld [vmem:[#allocation11 + $0xa0] sm:$0xff] }
 0x2b4   : > { %v885_v43 = vpop.f32.mrb[0].mxu1 }
 0x2b5   : > { %v1633_v44 = vpop.f32.mrb[1].mxu1  ;;  %1639 = vmatmul.mubr.msk.f32.vlgmr.msra.gmra.mrb[2].mxu0 %vm889_vm2, %v885_v43  ;;  %v763_v43 = vld [vmem:[#allocation11 + $0x8] sm:$0xff] }
 0x2b6   : > { %1712 = vmatpush3.bf16.msra.mxu0 %v2716_v8  ;;  %1673 = vmatprep.mubr.msk.f32.mxu0 %vm2272_vm0, %v2271_v0  ;;  %v744_v8 = vld [vmem:[%s3081_s10 + $0x78] sm:$0xff] }
 0x2b7   : > { %1713 = vmatprep.subr.bf16.mxu0 %v2274_v2  ;;  %v1749_v9 = vpack.c.bf16 %v744_v8, %v742_v7  ;;  %v780_v44 = vld [vmem:[#allocation11 + $0x90] sm:$0xff]  ;;  %v789_v7 = vld [vmem:[#allocation11 + $0xd8] sm:$0xff] }
 0x2ba   : > { %1715 = vmatpush3.bf16.msra.mxu0 %v1687_v11  ;;  %v743_v11 = vld [vmem:[%s3081_s10 + $0x70] sm:$0xff] }
 0x2bb   : > { %1716 = vmatprep.subr.bf16.mxu0 %v2274_v2 }
 0x2be   : > { %1718 = vmatpush3.bf16.msra.mxu0 %v1690_v14  ;;  %v1751_v14 = vpack.c.bf16 %v743_v11, %v741_v10  ;;  %v773_v10 = vld [vmem:[#allocation11 + $0x58] sm:$0xff]  ;;  %v790_v11 = vld [vmem:[#allocation11 + $0xe0] sm:$0xff] }
 0x2bf   : > { %1719 = vmatprep.subr.bf16.mxu0 %v2274_v2 }
 0x2c2   : > { %1721 = vmatpush3.bf16.msra.mxu0 %v1693_v17  ;;  %v747_v17 = vld [vmem:[%s3081_s10 + $0x90] sm:$0xff] }
 0x2c3   : > { %1722 = vmatprep.subr.bf16.mxu0 %v2274_v2 }
 0x2c6   : > { %1724 = vmatpush3.bf16.msra.mxu0 %v1696_v20  ;;  %v1755_v20 = vpack.c.bf16 %v747_v17, %v745_v16 }
 0x2c7   : > { %1725 = vmatprep.subr.bf16.mxu0 %v2274_v2 }
 0x2ca   : > { %1727 = vmatpush3.bf16.msra.mxu0 %v1699_v23  ;;  %v751_v23 = vld [vmem:[%s3081_s10 + $0xb0] sm:$0xff] }
 0x2cb   : > { %1728 = vmatprep.subr.bf16.mxu0 %v2274_v2 }
 0x2ce   : > { %1730 = vmatpush3.bf16.msra.mxu0 %v1702_v26  ;;  %v1759_v26 = vpack.c.bf16 %v751_v23, %v749_v22  ;;  %v793_v22 = vld [vmem:[#allocation11 + $0xf8] sm:$0xff] }
 0x2cf   : > { %1731 = vmatprep.subr.bf16.mxu0 %v2274_v2  ;;  %v740_v2 = vld [vmem:[%s3081_s10 + $0x58] sm:$0xff] }
 0x2d0   : > { %v1745_v4 = vpack.c.bf16 %v740_v2, %v738_v1  ;;  %v787_v1 = vld [vmem:[#allocation11 + $0xc8] sm:$0xff]  ;;  %v1783_v2 = vpack.c.bf16 %v769_v62, %v768_v61 }
 0x2d2   : > { %1733 = vmatpush3.bf16.msra.mxu0 %v1705_v29  ;;  %v755_v29 = vld [vmem:[%s3081_s10 + $0xd0] sm:$0xff] }
 0x2d3   : > { %v1763_v32 = vpack.c.bf16 %v755_v29, %v753_v28  ;;  %1770 = vmatprep.subr.bf16.mxu0 %v1769_v41  ;;  %v1511_v41 = vld [vmem:[%s3083_s29] ss:$0 sm:$0xff] }
 0x388   : > { %v959_v45 = vpop.f32.mrb[2].mxu0 }
 0x389   : > { %v2796_v46 = vsub.f32 %v2779_v42, %v959_v45  ;;  %v1640_v47 = vpop.f32.mrb[3].mxu0  ;;  %v781_v45 = vld [vmem:[#allocation11 + $0x98] sm:$0xff] }
 0x38a   : > { %v1771_v47 = vpack.c.bf16 %v763_v43, %v762_v40 }
 0x38b   : > { %v964_v48 = vmul.f32 %v2796_v46, %v2796_v46 }
 0x38d   : > { %1674 = vmatmul.mubr.f32.vlgmr.msra.gmra.mrb[4].mxu0 %v964_v48  ;;  %v1773_v48 = vpack.c.bf16 %v781_v45, %v780_v44 }
 0x38e   : > { %1772 = vmatpush3.bf16.msra.mxu0 %v1771_v47 }
 0x38f   : > { %1774 = vmatprep.subr.bf16.mxu0 %v1773_v48 }
 0x460   : > { %v1031_v52 = vpop.f32.mrb[4].mxu0 }
 0x461   : > { %v1032_v53 = vadd.f32 1e-05, %v1031_v52  ;;  %v1675_v54 = vpop.f32.mrb[5].mxu0  ;;  %v783_v52 = vld [vmem:[#allocation11 + $0xa8] sm:$0xff] }
 0x462   : > { %v1777_v54 = vpack.c.bf16 %v783_v52, %v782_v51 }
 0x463   : > { %1951 = vrsqrt.f32 %v1032_v53  ;;  %v1775_v53 = vpack.c.bf16 %v765_v50, %v764_v49 }
 0x465   : > { %1776 = vmatpush3.bf16.msra.mxu0 %v1775_v53 }
 0x466   : > { %1778 = vmatprep.subr.bf16.mxu0 %v1777_v54 }
 0x46d   : > { %v1952_v63 = vpop.eup %1951 }
 0x46e   : > { %1681 = vmatmul.mubr.msk.f32.vlgmr.msra.gmra.mrb[2].mxu1 %vm889_vm2, %v1952_v63  ;;  %v786_v63 = vld [vmem:[#allocation11 + $0xc0] sm:$0xff] }
 0x46f   : > { %1740 = vmatpush1.bf16.msra.mxu1 %v1739_v59  ;;  %1185 = vmatprep.mubr.f32.mxu1 %v2271_v0  ;;  %v1747_v0 = vpack.c.bf16 %v739_v6, %v737_v5  ;;  %v1779_v59 = vpack.c.bf16 %v767_v56, %v766_v55  ;;  %v771_v5 = vld [vmem:[#allocation11 + $0x48] sm:$0xff]  ;;  %v788_v6 = vld [vmem:[#allocation11 + $0xd0] sm:$0xff] }
 0x470   : > { %1742 = vmatprep.subr.bf16.mxu1 %v1741_v60  ;;  %v1781_v60 = vpack.c.bf16 %v785_v58, %v784_v57 }
 0x471   : > { %1780 = vmatpush3.bf16.msra.mxu0 %v1779_v59 }
 0x472   : > { %1782 = vmatprep.subr.bf16.mxu0 %v1781_v60 }
 0x473   : > { %1744 = vmatpush1.bf16.msra.mxu1 %v1743_v3  ;;  %v1785_v3 = vpack.c.bf16 %v787_v1, %v786_v63 }
 0x474   : > { %1746 = vmatprep.subr.bf16.mxu1 %v1745_v4  ;;  %v770_v4 = vld [vmem:[#allocation11 + $0x40] sm:$0xff] }
 0x475   : > { %1784 = vmatpush3.bf16.msra.mxu0 %v1783_v2  ;;  %v1787_v8 = vpack.c.bf16 %v771_v5, %v770_v4 }
 0x476   : > { %1786 = vmatprep.subr.bf16.mxu0 %v1785_v3 }
 0x477   : > { %1748 = vmatpush1.bf16.msra.mxu1 %v1747_v0  ;;  %v1789_v0 = vpack.c.bf16 %v789_v7, %v788_v6 }
 0x478   : > { %1750 = vmatprep.subr.bf16.mxu1 %v1749_v9  ;;  %v772_v9 = vld [vmem:[#allocation11 + $0x50] sm:$0xff] }
 0x479   : > { %1788 = vmatpush3.bf16.msra.mxu0 %v1787_v8  ;;  %v1791_v13 = vpack.c.bf16 %v773_v10, %v772_v9 }
 0x47a   : > { %1790 = vmatprep.subr.bf16.mxu0 %v1789_v0 }
 0x47b   : > { %1752 = vmatpush1.bf16.msra.mxu1 %v1751_v14  ;;  %v1793_v14 = vpack.c.bf16 %v791_v12, %v790_v11 }
 0x47c   : > { %1754 = vmatprep.subr.bf16.mxu1 %v1753_v15 }
 0x47d   : > { %1792 = vmatpush3.bf16.msra.mxu0 %v1791_v13 }
 0x47e   : > { %1794 = vmatprep.subr.bf16.mxu0 %v1793_v14 }
 0x47f   : > { %1756 = vmatpush1.bf16.msra.mxu1 %v1755_v20  ;;  %v1795_v20 = vpack.c.bf16 %v775_v19, %v774_v18 }
 0x480   : > { %1758 = vmatprep.subr.bf16.mxu1 %v1757_v21  ;;  %v792_v21 = vld [vmem:[#allocation11 + $0xf0] sm:$0xff] }
 0x481   : > { %1796 = vmatpush3.bf16.msra.mxu0 %v1795_v20  ;;  %v1797_v23 = vpack.c.bf16 %v793_v22, %v792_v21 }
 0x483   : > { %1760 = vmatpush1.bf16.msra.mxu1 %v1759_v26  ;;  %v1799_v26 = vpack.c.bf16 %v777_v25, %v776_v24  ;;  %1798 = vmatprep.subr.bf16.mxu0 %v1797_v23 }
 0x484   : > { %1762 = vmatprep.subr.bf16.mxu1 %v1761_v27  ;;  %v1111_v27 = vlaneseq }
 0x485   : > { %1800 = vmatpush3.bf16.msra.mxu0 %v1799_v26 }
 0x486   : > { %v1112_v28 = vshrl.u32 %v1111_v27, 7 }
 0x487   : > { %1764 = vmatpush1.bf16.msra.mxu1 %v1763_v32 }
 0x488   : > { %1766 = vmatprep.subr.bf16.mxu1 %v1765_v33  ;;  %v1113_v29 = vsub.s32 0, %v1112_v28  ;;  %v1117_v30 = vsub.s32 1, %v1112_v28 }
 0x48b   : > { %1768 = vmatpush1.bf16.msra.mxu1 %v1767_v36 }
 0x541   : > { %v1105_v15 = vpop.f32.mrb[2].mxu1 }
 0x542   : > { %v1109_v16 = vmul.f32 %v1105_v15, %v2796_v46  ;;  %v1682_v17 = vpop.f32.mrb[3].mxu1  ;;  %v761_v46 = vld [vmem:[%s3082_s14] sm:$0x3] }
 0x543   : > { %v1114_v31 = vrot.slane %v761_v46, %v1113_v29  ;;  %v1118_v32 = vrot.slane %v761_v46, %v1117_v30 }
 0x544   : > { %1186 = vmatmul.mubr.f32.vlgmr.msra.gmra.mrb[4].mxu1 %v1109_v16 }
 0x617   : > { %v1187_v33 = vpop.f32.mrb[4].mxu1 }
 0x618   : > { %v1188_v34 = vadd.f32 %v1187_v33, %v1114_v31  ;;  %v1189_v35 = vpop.f32.mrb[5].mxu1 }
 0x619   : > { %v1190_v36 = vadd.f32 %v1189_v35, %v1118_v32 }
 0x61a   : > { %v1192_v39 = vmax.f32 %v1188_v34, 0.0 }
 0x61b   : > { %v1193_v37 = vmax.f32 %v1190_v36, 0.0 }
 0x61d   : > { %1264 = vmatprep.mubr.f32.mxu0 %v1193_v37 }
 0x61e   : > { %1265 = vmatmul.mubr.f32.vlgmr.msra.gmra.mrb[6].mxu0 %v1192_v39 }
 0x6f1   : > { %v1591_v40 = vpop.f32.mrb[6].mxu0 }
 0x6f2   : > { %v1592_v43 = vpop.f32.mrb[7].mxu0 }
 0x6f3   : > { %v1593_v44 = vadd.f32 %v1592_v43, %v1591_v40 }
 0x6f5   : > { %v1267_v45 = vadd.f32 %v1593_v44, %v1511_v41 }
 0x6f7   : > { %v1270_v47 = vadd.f32 %v1267_v45, %v2779_v42 }
 0x6f9   : > { %v1271_v48 = vmul.f32 %v1270_v47, %v2776_v38 }
 0x6fb   : > { %1272 = vst [vmem:[%s617_s21] sm:$0xff] %v1271_v48 }
 0x6fc   : > { %2140 = shalt.err (!%p2137_p8)
}
 0x6fd   : > { %s2141_s24 = scalar_lea.hbm %s2914_s5, 128  ;;  %s2145_s8 = scalar_lea.hbm %s3086_s17, 512 }
 0x6fe   : > { %p2142_p5 = scmp.ne.s32.totalorder %s2914_s5, %s2141_s24  ;;  %p2146_p4 = scmp.lt.u32.totalorder %s2914_s5, %s3086_s17 }
 0x6ff   : > { %p2147_p12 = scmp.lt.u32.totalorder %s2145_s8, %s2141_s24  ;;  %p2149_p1 = scmp.lt.u32.totalorder %s2141_s24, %s2914_s5 }
 0x700   : > { %p2143_p13 = pnand %p2142_p5, %p3087_p6 }
 0x701   : > { %p2148_p10 = por %p2147_p12, %p2146_p4 }
 0x702   : > { %p2144_p11 = pneg %p2143_p13 }
 0x703   : > { %p2150_p9 = por %p2149_p1, %p2148_p10 }
 0x705   : > { %p2151_p2 = pnand %p2150_p9, %p2144_p11 }
 0x707   : > { %2154 = shalt.err (!%p2151_p2)
}
 0x708   : > { %1819 = dma.vmem_to_hbm [thread:$0]  (%p3087_p6), %s2916_s1, 128, %s2914_s5, %s1274_s12  }
 0x709 PF: > { %s3088_s29 = sld [smem:[#allocation20_spill]]  ;;  %s3089_s30 = sld [smem:[#allocation28_spill]] }
 0x70a   : > { %p1852_p3 = scmp.ge.s32.totalorder %s2261_s13, 2 }
 0x70f   : > { %s1302_s16 = sand.u32 1, %s3088_s29   ;;  %p3090_p0 = scmp.ne.s32.totalorder %s3089_s30, 0 }
 0x710   : > { %s1303_s27 = scalar_lea.sflag [#allocation4], %s1302_s16 }
 0x711   : > { %p1842_p7 = pnand %p1852_p3, %p3090_p0 }
 0x713   : > { %2216 = dma.done.wait (!%p1842_p7), %s1303_s27, 128  }
 0x714   : > { %2218 = vsyncadd (!%p1842_p7), %s1303_s27, 4294967168  ;;  %s33_s13 = sadd.s32 1, %s2261_s13   ;;  %s3091_s21 = sld [smem:[#allocation19_spill]] }
 0x715   : > { %p30_p8 = scmp.ge.s32.totalorder %s33_s13, 6   ;;  %s3092_s27 = sld [smem:[#allocation23_spill]] }
 0x716   : > { %s3093_s9 = sld [smem:[#allocation24_spill]]  ;;  %s3094_s29 = sld [smem:[#allocation26_spill]] }
 0x717   : > { %s3095_s30 = sld [smem:[#allocation27_spill]]  ;;  %s3096_s22 = smov %s2229_s23 }
 0x718   : > { %s3097_s23 = smov %s2579_s20  ;;  %s3098_s24 = smov %s2237_s25 }
 0x719   : > { %s3099_s25 = smov %s2241_s26  ;;  %s3100_s26 = smov %s2582_s28 }
 0x71a   :  { %32 = sbr.rel (!%p30_p8) target bundleno = 27 (0x1b), region = 155 }
 0x71c   : > { %s3101_s28 = smov %s3093_s9 }
 0x721   :  { %1308 = vsyncpa [#allocation3], 1 }
 0x722   :  { %1310 = vsyncpa [#allocation3 + $0x1], 1 }
 0x723   :  { %1311 = vsyncpa [#allocation6], 1 }
 0x724   :  { %1313 = vsyncpa [#allocation6 + $0x1], 1 }
 0x725   :  { %1314 = vsyncpa [#allocation9], 1 }
 0x726   :  { %1315 = vsyncpa [#allocation12], 1 }
 0x727   :  { %1316 = vsyncpa [#allocation4], 1 }
 0x728   :  { %1318 = vsyncpa [#allocation4 + $0x1], 1 }

</bundles_post_ra>
